<compile_context>
chip_gen: v7x
topology: tpu7x:2x2x1
jax: 0.10.0
libtpu: 0.0.40
codegen_flags: <defaults>
</compile_context>

<pallas_src>
import functools

import jax
import jax.numpy as jnp
from jax.experimental import pallas as pl
from jax.experimental.pallas import tpu as pltpu

INPUT_SIZE = 20
HIDDEN_SIZE = 64
OUTPUT_SIZE = 5
OUT_PAD = 128          # lane-dense padded output width (multiple of 128 lanes)
DEFAULT_TB = 1024      # batch tile (multiple of 8 sublanes)


def _round_up(x, m):
    return ((x + m - 1) // m) * m


def _mlp_kernel(x_ref, w1_ref, b1_ref, w2_ref, b2_ref, w3_ref, b3_ref, o_ref):
    # bf16 MXU operands, f32 accumulation; elementwise (bias, ReLU) kept in f32.
    x = x_ref[...].astype(jnp.bfloat16)

    h1 = jnp.dot(x, w1_ref[...], preferred_element_type=jnp.float32) + b1_ref[...]
    h1 = jnp.maximum(h1, 0.0)

    h2 = jnp.dot(h1.astype(jnp.bfloat16), w2_ref[...],
                 preferred_element_type=jnp.float32) + b2_ref[...]
    h2 = jnp.maximum(h2, 0.0)

    logits = jnp.dot(h2.astype(jnp.bfloat16), w3_ref[...],
                     preferred_element_type=jnp.float32) + b3_ref[...]
    o_ref[...] = logits  # (TB, 128) lane-dense f32 store (real logits in cols [:5])


@functools.partial(jax.jit, static_argnames=("tb",))
def policy_network_forward(obs, params, *, tb=DEFAULT_TB):
    """obs: (B, INPUT_SIZE) f32. params: dict w1,b1,w2,b2,w3,b3 (weights bf16, biases f32)."""
    B, in_size = obs.shape
    hidden = params["w1"].shape[1]
    out_size = params["w3"].shape[1]

    # Batch tile: multiple of 8 (sublane rule), capped at `tb`.
    TB = min(tb, _round_up(B, 8))
    Bp = _round_up(B, TB)
    if Bp != B:
        obs = jnp.pad(obs, ((0, Bp - B), (0, 0)))

    # Zero-pad the last layer to a lane-dense 128-wide output slab (padded
    # columns produce zeros + padded bias; they are sliced away below).
    w3p = jnp.pad(params["w3"], ((0, 0), (0, OUT_PAD - out_size)))
    b3p = jnp.pad(params["b3"], ((0, 0), (0, OUT_PAD - out_size)))

    n_tiles = Bp // TB

    grid_spec = pltpu.PrefetchScalarGridSpec(
        num_scalar_prefetch=0,
        grid=(n_tiles,),
        in_specs=[
            pl.BlockSpec((TB, in_size), lambda i: (i, 0)),      # obs tile (streamed)
            pl.BlockSpec((in_size, hidden), lambda i: (0, 0)),  # w1 (VMEM-resident)
            pl.BlockSpec((1, hidden), lambda i: (0, 0)),        # b1
            pl.BlockSpec((hidden, hidden), lambda i: (0, 0)),   # w2
            pl.BlockSpec((1, hidden), lambda i: (0, 0)),        # b2
            pl.BlockSpec((hidden, OUT_PAD), lambda i: (0, 0)),  # w3 (padded)
            pl.BlockSpec((1, OUT_PAD), lambda i: (0, 0)),       # b3 (padded)
        ],
        out_specs=pl.BlockSpec((TB, OUT_PAD), lambda i: (i, 0)),
    )

    flops = 2 * Bp * (in_size * hidden + hidden * hidden + hidden * OUT_PAD)
    bytes_accessed = (Bp * (in_size * 4 + OUT_PAD * 4)
                      + 2 * (in_size * hidden + hidden * hidden + hidden * OUT_PAD)
                      + 4 * (2 * hidden + OUT_PAD))

    logits_padded = pl.pallas_call(
        _mlp_kernel,
        out_shape=jax.ShapeDtypeStruct((Bp, OUT_PAD), jnp.float32),
        grid_spec=grid_spec,
        compiler_params=pltpu.CompilerParams(
            dimension_semantics=("parallel",)),
        cost_estimate=pl.CostEstimate(
            flops=flops, transcendentals=0, bytes_accessed=bytes_accessed),
    )(obs, params["w1"], params["b1"], params["w2"], params["b2"], w3p, b3p)

    return logits_padded[:B, :out_size]


def init_params(key, input_size=INPUT_SIZE, output_size=OUTPUT_SIZE, hidden_size=HIDDEN_SIZE):
    """PyTorch nn.Linear-style U(-1/sqrt(fan_in), 1/sqrt(fan_in)) init.
    Weights stored (in, out) in bf16 (MXU-native on v6e/v7x); biases (1, out) f32."""
    keys = jax.random.split(key, 6)

    def linear(kw, kb, fan_in, fan_out):
        bound = 1.0 / jnp.sqrt(fan_in)
        w = jax.random.uniform(kw, (fan_in, fan_out), jnp.float32, -bound, bound)
        b = jax.random.uniform(kb, (1, fan_out), jnp.float32, -bound, bound)
        return w.astype(jnp.bfloat16), b

    w1, b1 = linear(keys[0], keys[1], input_size, hidden_size)
    w2, b2 = linear(keys[2], keys[3], hidden_size, hidden_size)
    w3, b3 = linear(keys[4], keys[5], hidden_size, output_size)
    return {"w1": w1, "b1": b1, "w2": w2, "b2": b2, "w3": w3, "b3": b3}


def _reference_forward(obs, p):
    """Pure-JAX reference with the same numerics as the kernel
    (bf16 matmul operands, f32 accumulation)."""
    def mm(x, w):
        return jnp.dot(x.astype(jnp.bfloat16), w, preferred_element_type=jnp.float32)
    h1 = jnp.maximum(mm(obs, p["w1"]) + p["b1"], 0.0)
    h2 = jnp.maximum(mm(h1, p["w2"]) + p["b2"], 0.0)
    return mm(h2, p["w3"]) + p["b3"]


if __name__ == "__main__":
    key = jax.random.PRNGKey(0)
    k_obs, k_params = jax.random.split(key)

    batch = 8
    obs = jax.random.normal(k_obs, (batch, INPUT_SIZE), dtype=jnp.float32)
    params = init_params(k_params)

    logits = policy_network_forward(obs, params)
    logits = jax.block_until_ready(logits)

    ref = _reference_forward(obs, params)
    assert logits.shape == (batch, OUTPUT_SIZE), logits.shape
    assert jnp.allclose(logits, ref, atol=1e-3, rtol=1e-3)

    print("KERNEL_OK")
</pallas_src>

<mosaic_0001>
module attributes {stable_mosaic.version = 11 : i64} {
  func.func @_mlp_kernel(%arg0: i32, %arg1: memref<8x20xf32, #tpu.memory_space<vmem>>, %arg2: memref<20x64xbf16, #tpu.memory_space<vmem>>, %arg3: memref<1x64xf32, #tpu.memory_space<vmem>>, %arg4: memref<64x64xbf16, #tpu.memory_space<vmem>>, %arg5: memref<1x64xf32, #tpu.memory_space<vmem>>, %arg6: memref<64x128xbf16, #tpu.memory_space<vmem>>, %arg7: memref<1x128xf32, #tpu.memory_space<vmem>>, %arg8: memref<8x128xf32, #tpu.memory_space<vmem>>) attributes {dimension_semantics = [#tpu.dimension_semantics<parallel>], iteration_bounds = array<i64: 1>, scalar_prefetch = 0 : i64, scratch_operands = 0 : i64, tpu.core_type = #tpu.core_type<tc>, window_params = [{transform_indices = @transform_0, window_bounds = array<i64: 8, 20>}, {pipeline_mode = #tpu.pipeline_mode<synchronous>, transform_indices = @transform_1, window_bounds = array<i64: 20, 64>}, {pipeline_mode = #tpu.pipeline_mode<synchronous>, transform_indices = @transform_2, window_bounds = array<i64: 1, 64>}, {pipeline_mode = #tpu.pipeline_mode<synchronous>, transform_indices = @transform_3, window_bounds = array<i64: 64, 64>}, {pipeline_mode = #tpu.pipeline_mode<synchronous>, transform_indices = @transform_4, window_bounds = array<i64: 1, 64>}, {pipeline_mode = #tpu.pipeline_mode<synchronous>, transform_indices = @transform_5, window_bounds = array<i64: 64, 128>}, {pipeline_mode = #tpu.pipeline_mode<synchronous>, transform_indices = @transform_6, window_bounds = array<i64: 1, 128>}, {transform_indices = @transform_7, window_bounds = array<i64: 8, 128>}]} {
    %c0 = arith.constant 0 : index
    %c0_0 = arith.constant 0 : index
    %0 = vector.load %arg1[%c0, %c0_0] : memref<8x20xf32, #tpu.memory_space<vmem>>, vector<8x20xf32>
    %1 = arith.truncf %0 : vector<8x20xf32> to vector<8x20xbf16>
    %c0_1 = arith.constant 0 : index
    %c0_2 = arith.constant 0 : index
    %2 = vector.load %arg2[%c0_1, %c0_2] : memref<20x64xbf16, #tpu.memory_space<vmem>>, vector<20x64xbf16>
    %cst = arith.constant dense<0.000000e+00> : vector<8x64xf32>
    %3 = tpu.matmul %1, %2, %cst {dimension_numbers = #tpu.dot_dimension_numbers<[1], [0], [0], [1], [0, 0, 1, 1], [], []>} : vector<8x20xbf16>, vector<20x64xbf16>, vector<8x64xf32> -> vector<8x64xf32>
    %c0_3 = arith.constant 0 : index
    %c0_4 = arith.constant 0 : index
    %4 = vector.load %arg3[%c0_3, %c0_4] : memref<1x64xf32, #tpu.memory_space<vmem>>, vector<1x64xf32>
    %5 = vector.broadcast %4 : vector<1x64xf32> to vector<8x64xf32>
    %6 = arith.addf %3, %5 : vector<8x64xf32>
    %cst_5 = arith.constant 0.000000e+00 : f32
    %7 = vector.broadcast %cst_5 : f32 to vector<8x64xf32>
    %8 = arith.maximumf %6, %7 : vector<8x64xf32>
    %9 = arith.truncf %8 : vector<8x64xf32> to vector<8x64xbf16>
    %c0_6 = arith.constant 0 : index
    %c0_7 = arith.constant 0 : index
    %10 = vector.load %arg4[%c0_6, %c0_7] : memref<64x64xbf16, #tpu.memory_space<vmem>>, vector<64x64xbf16>
    %cst_8 = arith.constant dense<0.000000e+00> : vector<8x64xf32>
    %11 = tpu.matmul %9, %10, %cst_8 {dimension_numbers = #tpu.dot_dimension_numbers<[1], [0], [0], [1], [0, 0, 1, 1], [], []>} : vector<8x64xbf16>, vector<64x64xbf16>, vector<8x64xf32> -> vector<8x64xf32>
    %c0_9 = arith.constant 0 : index
    %c0_10 = arith.constant 0 : index
    %12 = vector.load %arg5[%c0_9, %c0_10] : memref<1x64xf32, #tpu.memory_space<vmem>>, vector<1x64xf32>
    %13 = vector.broadcast %12 : vector<1x64xf32> to vector<8x64xf32>
    %14 = arith.addf %11, %13 : vector<8x64xf32>
    %cst_11 = arith.constant 0.000000e+00 : f32
    %15 = vector.broadcast %cst_11 : f32 to vector<8x64xf32>
    %16 = arith.maximumf %14, %15 : vector<8x64xf32>
    %17 = arith.truncf %16 : vector<8x64xf32> to vector<8x64xbf16>
    %c0_12 = arith.constant 0 : index
    %c0_13 = arith.constant 0 : index
    %18 = vector.load %arg6[%c0_12, %c0_13] : memref<64x128xbf16, #tpu.memory_space<vmem>>, vector<64x128xbf16>
    %cst_14 = arith.constant dense<0.000000e+00> : vector<8x128xf32>
    %19 = tpu.matmul %17, %18, %cst_14 {dimension_numbers = #tpu.dot_dimension_numbers<[1], [0], [0], [1], [0, 0, 1, 1], [], []>} : vector<8x64xbf16>, vector<64x128xbf16>, vector<8x128xf32> -> vector<8x128xf32>
    %c0_15 = arith.constant 0 : index
    %c0_16 = arith.constant 0 : index
    %20 = vector.load %arg7[%c0_15, %c0_16] : memref<1x128xf32, #tpu.memory_space<vmem>>, vector<1x128xf32>
    %21 = vector.broadcast %20 : vector<1x128xf32> to vector<8x128xf32>
    %22 = arith.addf %19, %21 : vector<8x128xf32>
    %c0_17 = arith.constant 0 : index
    %c0_18 = arith.constant 0 : index
    %23 = vector.load %arg8[%c0_17, %c0_18] : memref<8x128xf32, #tpu.memory_space<vmem>>, vector<8x128xf32>
    tpu.vector_store %arg8[%c0_17, %c0_18], %22 {strides = array<i32>} : memref<8x128xf32, #tpu.memory_space<vmem>>, vector<8x128xf32>,
    return
  }
  func.func @transform_0(%arg0: i32) -> (i32, i32) {
    %c0_i32 = arith.constant 0 : i32
    %c0_i32_0 = arith.constant 0 : i32
    return %arg0, %c0_i32 : i32, i32
  }
  func.func @transform_1(%arg0: i32) -> (i32, i32) {
    %c0_i32 = arith.constant 0 : i32
    %c0_i32_0 = arith.constant 0 : i32
    %c0_i32_1 = arith.constant 0 : i32
    return %c0_i32, %c0_i32_0 : i32, i32
  }
  func.func @transform_2(%arg0: i32) -> (i32, i32) {
    %c0_i32 = arith.constant 0 : i32
    %c0_i32_0 = arith.constant 0 : i32
    %c0_i32_1 = arith.constant 0 : i32
    return %c0_i32, %c0_i32_0 : i32, i32
  }
  func.func @transform_3(%arg0: i32) -> (i32, i32) {
    %c0_i32 = arith.constant 0 : i32
    %c0_i32_0 = arith.constant 0 : i32
    %c0_i32_1 = arith.constant 0 : i32
    return %c0_i32, %c0_i32_0 : i32, i32
  }
  func.func @transform_4(%arg0: i32) -> (i32, i32) {
    %c0_i32 = arith.constant 0 : i32
    %c0_i32_0 = arith.constant 0 : i32
    %c0_i32_1 = arith.constant 0 : i32
    return %c0_i32, %c0_i32_0 : i32, i32
  }
  func.func @transform_5(%arg0: i32) -> (i32, i32) {
    %c0_i32 = arith.constant 0 : i32
    %c0_i32_0 = arith.constant 0 : i32
    %c0_i32_1 = arith.constant 0 : i32
    return %c0_i32, %c0_i32_0 : i32, i32
  }
  func.func @transform_6(%arg0: i32) -> (i32, i32) {
    %c0_i32 = arith.constant 0 : i32
    %c0_i32_0 = arith.constant 0 : i32
    %c0_i32_1 = arith.constant 0 : i32
    return %c0_i32, %c0_i32_0 : i32, i32
  }
  func.func @transform_7(%arg0: i32) -> (i32, i32) {
    %c0_i32 = arith.constant 0 : i32
    %c0_i32_0 = arith.constant 0 : i32
    return %arg0, %c0_i32 : i32, i32
  }
}

</mosaic_0001>

<bundles_post_ra>
// kernel: policy_network_forward.1
= control target key start
LH: loop header
LB: loop body
LE: loop exit
PB: predicated region body
PF: predicated region fallthrough
CT: control target
= control target key end

     0   :  { %v379_v1 = vmov 0.0   ;;  %vm53_vm0 = vcmask 1041408   ;;  %vm380_vm1 = vmmov 0   ;;  %vm49_vm2 = vcmask 162816   ;;  %s478_s0 = inlined_call_operand.vmem [shape: f32[8,20], index: 0, kind: input, shape index: {}]   ;;  %s479_s1 = inlined_call_operand.vmem [shape: bf16[20,64], index: 1, kind: input, shape index: {}]   ;;  %s480_s2 = inlined_call_operand.vmem [shape: f32[1,64], index: 2, kind: input, shape index: {}]   ;;  %s481_s3 = inlined_call_operand.vmem [shape: bf16[64,64], index: 3, kind: input, shape index: {}]   ;;  %s482_s4 = inlined_call_operand.vmem [shape: f32[1,64], index: 4, kind: input, shape index: {}]   ;;  %s483_s5 = inlined_call_operand.vmem [shape: bf16[64,128], index: 5, kind: input, shape index: {}]   ;;  %s484_s6 = inlined_call_operand.vmem [shape: f32[1,128], index: 6, kind: input, shape index: {}]   ;;  %s485_s7 = inlined_call_operand.hbm [shape: f32[8,128], index: 7, kind: output, shape index: {}]  }
   0x1   :  { %v345_v0 = vld [vmem:[%s479_s1] sm:$0xff]   ;;  %310 = vmatprep.subr.bf16.mxu0 %v379_v1  ;;  %v346_v2 = vld [vmem:[%s479_s1 + $0x8] ss:$0 sps:$4 sm:$0x33]   ;;  %318 = vmatprep.subr.bf16.mxu1 %v379_v1 }
   0x2   :  { %311 = vmatpush3.bf16.msra.mxu0 %v345_v0  ;;  %v28_v3 = vld [vmem:[%s478_s0] sm:$0xff]  ;;  %v55_v5 = vsel %vm53_vm0, %v346_v2, 0  ;;  %314 = vmatprep.mubr.msk.bf16.mxu0 %vm380_vm1, %v379_v1  ;;  %v348_v6 = vld [vmem:[%s481_s3 + $0x8] sm:$0xff]  }
   0x3   :  { %v347_v4 = vld [vmem:[%s481_s3] sm:$0xff]   ;;  %312 = vmatprep.subr.bf16.mxu0 %v379_v1  ;;  %326 = vmatprep.mubr.msk.bf16.mxu1 %vm380_vm1, %v379_v1  ;;  %v29_v7 = vpack.c.bf16 %v28_v3, %v28_v3 }
   0x4   :  { %319 = vmatpush3.bf16.msra.mxu1 %v347_v4 }
   0x5   :  { %320 = vmatprep.subr.bf16.mxu1 %v379_v1 }
   0x6   :  { %313 = vmatpush3.bf16.msra.mxu0 %v55_v5 }
   0x7   :  { %330 = vmatprep.subr.bf16.mxu0 %v379_v1 }
   0x8   :  { %321 = vmatpush3.bf16.msra.mxu1 %v348_v6 }
   0x9   :  { %12 = vsyncpa [#allocation3], 0  ;;  %315 = vmatmul.mubr.msk.bf16.vlgmr.msra.gmra.mrb[0].mxu0 %vm49_vm2, %v29_v7  ;;  %322 = vmatprep.subr.bf16.mxu1 %v379_v1  ;;  %v349_v8 = vld [vmem:[%s481_s3 + $0x10] sm:$0xff]   ;;  %v350_v9 = vld [vmem:[%s481_s3 + $0x18] sm:$0xff]   ;;  %vm138_vm3 = vcmask 523264   ;;  %s381_s25 = smov [#allocation2]  }
   0xa   :  { %338 = vmatprep.mubr.msk.bf16.mxu0 %vm380_vm1, %v379_v1  ;;  %v351_v10 = vld [vmem:[%s483_s5] sm:$0xff]   ;;  %v352_v11 = vld [vmem:[%s483_s5 + $0x8] sm:$0xff]   ;;  %v353_v20 = vld [vmem:[%s483_s5 + $0x10] sm:$0xff]  }
   0xb   :  { %331 = vmatpush3.bf16.msra.mxu0 %v351_v10  ;;  %v281_v12 = vld [vmem:[%s480_s2] ss:$0 sm:$0xff]  ;;  %v354_v21 = vld [vmem:[%s483_s5 + $0x18] sm:$0xff]   ;;  %s273_s5 = sshll.u32 %s381_s25, 4  ;;  %s274_s5 = int_to_ptr.vmem [resolvable:$true] %s273_s5 }
   0xc   :  { %323 = vmatpush3.bf16.msra.mxu1 %v349_v8  ;;  %332 = vmatprep.subr.bf16.mxu0 %v379_v1  ;;  %v285_v22 = vld [vmem:[%s482_s4] ss:$0 sm:$0xff]  ;;  %s355_s4 = scalar_lea.vmem %s274_s5, 128  ;;  %p360_p1 = scmp.lt.s32.totalorder %s274_s5, %s274_s5 }
   0xd   :  { %324 = vmatprep.subr.bf16.mxu1 %v379_v1  ;;  %v291_v30 = vld [vmem:[%s484_s6] ss:$0 sm:$0xff]  ;;  %p356_p0 = scmp.ne.s32.totalorder %s274_s5, %s355_s4  ;;  %p361_p2 = scmp.lt.s32.totalorder %s355_s4, %s355_s4 }
   0xf   :  { %333 = vmatpush3.bf16.msra.mxu0 %v352_v11  ;;  %p362_p3 = por %p361_p2, %p360_p1 }
  0x10   :  { %325 = vmatpush3.bf16.msra.mxu1 %v350_v9  ;;  %334 = vmatprep.subr.bf16.mxu0 %v379_v1 }
  0x11   :  { %p363_p4 = pnand %p362_p3, %p356_p0 }
  0x13   :  { %335 = vmatpush3.bf16.msra.mxu0 %v353_v20 }
  0x14   :  { %336 = vmatprep.subr.bf16.mxu0 %v379_v1 }
  0x17   :  { %337 = vmatpush3.bf16.msra.mxu0 %v354_v21 }
  0xdc   :  { %v91_v13 = vpop.f32.mrb[0].mxu0 }
  0xdd   :  { %v92_v14 = vadd.f32 %v281_v12, %v91_v13  ;;  %v316_v15 = vpop.f32.mrb[1].mxu0 }
  0xde   :  { %v94_v16 = vpop.f32.mrb[2].mxu0 }
  0xdf   :  { %v97_v17 = vmax.f32 %v92_v14, 0.0  ;;  %v317_v18 = vpop.f32.mrb[3].mxu0 }
  0xe1   :  { %v98_v19 = vpack.c.bf16 %v97_v17, %v97_v17 }
  0xe3   :  { %327 = vmatmul.mubr.msk.bf16.vlgmr.msra.gmra.mrb[0].mxu1 %vm138_vm3, %v98_v19 }
 0x1b6   :  { %v176_v23 = vpop.f32.mrb[0].mxu1 }
 0x1b7   :  { %v177_v24 = vadd.f32 %v285_v22, %v176_v23  ;;  %v328_v25 = vpop.f32.mrb[1].mxu1 }
 0x1b8   :  { %v179_v26 = vpop.f32.mrb[2].mxu1 }
 0x1b9   :  { %v182_v27 = vmax.f32 %v177_v24, 0.0  ;;  %v329_v28 = vpop.f32.mrb[3].mxu1 }
 0x1bb   :  { %v183_v29 = vpack.c.bf16 %v182_v27, %v182_v27 }
 0x1bd   :  { %339 = vmatmul.mubr.msk.bf16.vlgmr.msra.gmra.mrb[4].mxu0 %vm138_vm3, %v183_v29 }
 0x290   :  { %v260_v31 = vpop.f32.mrb[4].mxu0 }
 0x291   :  { %v261_v32 = vadd.f32 %v291_v30, %v260_v31  ;;  %v340_v33 = vpop.f32.mrb[5].mxu0 }
 0x292   :  { %v263_v34 = vpop.f32.mrb[6].mxu0 }
 0x293   :  { %266 = vst [vmem:[#allocation2] sm:$0xff] %v261_v32  ;;  %v341_v35 = vpop.f32.mrb[7].mxu0 }
 0x294   :  { %366 = shalt.err (!%p363_p4)
}
 0x295   :  { %s367_s6 = scalar_lea.hbm %s485_s7, 128 }
 0x296   :  { %p368_p5 = scmp.ne.s32.totalorder %s485_s7, %s367_s6  ;;  %p371_p6 = scmp.lt.u32.totalorder %s367_s6, %s485_s7 }
 0x298   :  { %p373_p7 = pnand %p371_p6, %p368_p5 }
 0x29a   :  { %376 = shalt.err (!%p373_p7)
}
 0x29b   :  { %276 = dma.vmem_to_hbm [thread:$0]  %s274_s5, 128, %s485_s7, [#allocation3]  }
 0x29c   :  { %377 = dma.done.wait [#allocation3], 128  }
 0x29d   :  { %378 = vsyncadd [#allocation3], 4294967168 }
 0x29e   :  { %280 = vsyncpa [#allocation3], 1 }

</bundles_post_ra>
